<compile_context>
chip_gen: v6e
topology: v6e:2x2x1
jax: 0.10.0
libtpu: 0.0.40
codegen_flags: <defaults>
</compile_context>

<pallas_src>
import jax
import jax.numpy as jnp
from jax.experimental import pallas as pl
from jax.experimental.pallas import tpu as pltpu


def _round_up(n, m):
    return ((n + m - 1) // m) * m


def _mlp_multitask_kernel(x_ref, w1_ref, b1_ref, w2_ref, b2_ref, wh_ref, bh_ref, out_ref):
    # x_ref: [3, TB]   (features on sublanes, batch on lanes)
    x = x_ref[...]

    # shared[0]: Linear(3, 32) + ReLU     -> h1 [32, TB]
    h1 = jnp.dot(w1_ref[...], x, preferred_element_type=jnp.float32) + b1_ref[...]
    h1 = jnp.maximum(h1, 0.0)

    # shared[2]: Dropout(0.3) -> identity (eval mode)

    # shared[3]: Linear(32, 16) + ReLU    -> h2 [16, TB]
    h2 = jnp.dot(w2_ref[...], h1, preferred_element_type=jnp.float32) + b2_ref[...]
    h2 = jnp.maximum(h2, 0.0)

    # Fused heads: [2, 16] @ [16, TB] + [2, 1] -> [2, TB]  (row 0 = churn, row 1 = ltv)
    out_ref[...] = jnp.dot(wh_ref[...], h2, preferred_element_type=jnp.float32) + bh_ref[...]


def multitask_forward(x, params, *, tile_b=None):
    """x: [B, 3] float32.  params: dict (feature-major weights).  Returns (churn [B,1], ltv [B,1])."""
    B = x.shape[0]

    # Batch tile: multiple of 128 lanes; large tiles for big batches, minimal padding for small.
    if tile_b is None:
        tile_b = min(8192, _round_up(max(B, 1), 128))
    Bp = _round_up(B, tile_b)
    grid = (Bp // tile_b,)

    # Feature-major, padded-to-tile input: [3, Bp]
    x_t = jnp.pad(x.T.astype(jnp.float32), ((0, 0), (0, Bp - B)))

    w1, b1 = params["w1"], params["b1"]   # [32, 3], [32, 1]
    w2, b2 = params["w2"], params["b2"]   # [16, 32], [16, 1]
    wh, bh = params["wh"], params["bh"]   # [2, 16],  [2, 1]

    weight_bytes = 4 * (w1.size + b1.size + w2.size + b2.size + wh.size + bh.size)
    cost = pl.CostEstimate(
        flops=2 * Bp * (3 * 32 + 32 * 16 + 16 * 2),
        transcendentals=0,
        bytes_accessed=Bp * (3 + 2) * 4 + weight_bytes,
    )

    def const_spec(shape):
        return pl.BlockSpec(shape, lambda i: (0, 0))

    out = pl.pallas_call(
        _mlp_multitask_kernel,
        out_shape=jax.ShapeDtypeStruct((2, Bp), jnp.float32),
        grid=grid,
        in_specs=[
            pl.BlockSpec((3, tile_b), lambda i: (0, i)),   # x tile streams over batch
            const_spec(w1.shape), const_spec(b1.shape),    # weights stay VMEM-resident
            const_spec(w2.shape), const_spec(b2.shape),
            const_spec(wh.shape), const_spec(bh.shape),
        ],
        out_specs=pl.BlockSpec((2, tile_b), lambda i: (0, i)),
        compiler_params=pltpu.CompilerParams(dimension_semantics=("parallel",)),
        cost_estimate=cost,
    )(x_t, w1, b1, w2, b2, wh, bh)

    churn = out[0, :B].reshape(B, 1)
    ltv = out[1, :B].reshape(B, 1)
    return churn, ltv


def init_params(key):
    """Deterministic init mirroring PyTorch nn.Linear default U(-1/sqrt(fan_in), +1/sqrt(fan_in)).
    Weights stored feature-major [out, in]; biases as [out, 1] for lane broadcasting.
    The two heads are fused into a single [2, 16] weight / [2, 1] bias."""
    def linear(key, fan_in, fan_out):
        kw, kb = jax.random.split(key)
        bound = 1.0 / jnp.sqrt(float(fan_in))
        w = jax.random.uniform(kw, (fan_out, fan_in), jnp.float32, -bound, bound)
        b = jax.random.uniform(kb, (fan_out, 1), jnp.float32, -bound, bound)
        return w, b

    k1, k2, k3, k4 = jax.random.split(key, 4)
    w1, b1 = linear(k1, 3, 32)     # Linear(3, 32)
    w2, b2 = linear(k2, 32, 16)    # Linear(32, 16)
    wc, bc = linear(k3, 16, 1)     # churn_head
    wl, bl = linear(k4, 16, 1)     # ltv_head
    wh = jnp.concatenate([wc, wl], axis=0)   # [2, 16]
    bh = jnp.concatenate([bc, bl], axis=0)   # [2, 1]
    return {"w1": w1, "b1": b1, "w2": w2, "b2": b2, "wh": wh, "bh": bh}


if __name__ == "__main__":
    key = jax.random.PRNGKey(0)
    k_params, k_x = jax.random.split(key)

    params = init_params(k_params)
    B = 8
    x = jax.random.normal(k_x, (B, 3), dtype=jnp.float32)

    churn, ltv = multitask_forward(x, params)
    jax.block_until_ready((churn, ltv))

    # Pure-JAX reference (PyTorch convention: y = x @ W.T + b, W = [out, in]).
    h1 = jnp.maximum(x @ params["w1"].T + params["b1"].T, 0.0)
    h2 = jnp.maximum(h1 @ params["w2"].T + params["b2"].T, 0.0)
    heads = h2 @ params["wh"].T + params["bh"].T              # [B, 2]
    churn_ref = heads[:, 0:1]
    ltv_ref = heads[:, 1:2]

    assert churn.shape == (B, 1) and ltv.shape == (B, 1)
    assert jnp.allclose(churn, churn_ref, atol=1e-5)
    assert jnp.allclose(ltv, ltv_ref, atol=1e-5)

    print("KERNEL_OK")
</pallas_src>

<mosaic_0001>
module attributes {stable_mosaic.version = 11 : i64} {
  func.func @_mlp_multitask_kernel(%arg0: i32, %arg1: memref<3x128xf32, #tpu.memory_space<vmem>>, %arg2: memref<32x3xf32, #tpu.memory_space<vmem>>, %arg3: memref<32x1xf32, #tpu.memory_space<vmem>>, %arg4: memref<16x32xf32, #tpu.memory_space<vmem>>, %arg5: memref<16x1xf32, #tpu.memory_space<vmem>>, %arg6: memref<2x16xf32, #tpu.memory_space<vmem>>, %arg7: memref<2x1xf32, #tpu.memory_space<vmem>>, %arg8: memref<2x128xf32, #tpu.memory_space<vmem>>) attributes {dimension_semantics = [#tpu.dimension_semantics<parallel>], iteration_bounds = array<i64: 1>, scalar_prefetch = 0 : i64, scratch_operands = 0 : i64, tpu.core_type = #tpu.core_type<tc>, window_params = [{transform_indices = @transform_0, window_bounds = array<i64: 3, 128>}, {pipeline_mode = #tpu.pipeline_mode<synchronous>, transform_indices = @transform_1, window_bounds = array<i64: 32, 3>}, {pipeline_mode = #tpu.pipeline_mode<synchronous>, transform_indices = @transform_2, window_bounds = array<i64: 32, 1>}, {pipeline_mode = #tpu.pipeline_mode<synchronous>, transform_indices = @transform_3, window_bounds = array<i64: 16, 32>}, {pipeline_mode = #tpu.pipeline_mode<synchronous>, transform_indices = @transform_4, window_bounds = array<i64: 16, 1>}, {pipeline_mode = #tpu.pipeline_mode<synchronous>, transform_indices = @transform_5, window_bounds = array<i64: 2, 16>}, {pipeline_mode = #tpu.pipeline_mode<synchronous>, transform_indices = @transform_6, window_bounds = array<i64: 2, 1>}, {transform_indices = @transform_7, window_bounds = array<i64: 2, 128>}]} {
    %c0 = arith.constant 0 : index
    %c0_0 = arith.constant 0 : index
    %0 = vector.load %arg1[%c0, %c0_0] : memref<3x128xf32, #tpu.memory_space<vmem>>, vector<3x128xf32>
    %c0_1 = arith.constant 0 : index
    %c0_2 = arith.constant 0 : index
    %1 = vector.load %arg2[%c0_1, %c0_2] : memref<32x3xf32, #tpu.memory_space<vmem>>, vector<32x3xf32>
    %cst = arith.constant dense<0.000000e+00> : vector<32x128xf32>
    %2 = tpu.matmul %1, %0, %cst {dimension_numbers = #tpu.dot_dimension_numbers<[1], [0], [0], [1], [0, 0, 1, 1], [], []>} : vector<32x3xf32>, vector<3x128xf32>, vector<32x128xf32> -> vector<32x128xf32>
    %c0_3 = arith.constant 0 : index
    %c0_4 = arith.constant 0 : index
    %3 = vector.load %arg3[%c0_3, %c0_4] : memref<32x1xf32, #tpu.memory_space<vmem>>, vector<32x1xf32>
    %4 = vector.broadcast %3 : vector<32x1xf32> to vector<32x128xf32>
    %5 = arith.addf %2, %4 : vector<32x128xf32>
    %cst_5 = arith.constant 0.000000e+00 : f32
    %6 = vector.broadcast %cst_5 : f32 to vector<32x128xf32>
    %7 = arith.maximumf %5, %6 : vector<32x128xf32>
    %c0_6 = arith.constant 0 : index
    %c0_7 = arith.constant 0 : index
    %8 = vector.load %arg4[%c0_6, %c0_7] : memref<16x32xf32, #tpu.memory_space<vmem>>, vector<16x32xf32>
    %cst_8 = arith.constant dense<0.000000e+00> : vector<16x128xf32>
    %9 = tpu.matmul %8, %7, %cst_8 {dimension_numbers = #tpu.dot_dimension_numbers<[1], [0], [0], [1], [0, 0, 1, 1], [], []>} : vector<16x32xf32>, vector<32x128xf32>, vector<16x128xf32> -> vector<16x128xf32>
    %c0_9 = arith.constant 0 : index
    %c0_10 = arith.constant 0 : index
    %10 = vector.load %arg5[%c0_9, %c0_10] : memref<16x1xf32, #tpu.memory_space<vmem>>, vector<16x1xf32>
    %11 = vector.broadcast %10 : vector<16x1xf32> to vector<16x128xf32>
    %12 = arith.addf %9, %11 : vector<16x128xf32>
    %cst_11 = arith.constant 0.000000e+00 : f32
    %13 = vector.broadcast %cst_11 : f32 to vector<16x128xf32>
    %14 = arith.maximumf %12, %13 : vector<16x128xf32>
    %c0_12 = arith.constant 0 : index
    %c0_13 = arith.constant 0 : index
    %15 = vector.load %arg6[%c0_12, %c0_13] : memref<2x16xf32, #tpu.memory_space<vmem>>, vector<2x16xf32>
    %cst_14 = arith.constant dense<0.000000e+00> : vector<2x128xf32>
    %16 = tpu.matmul %15, %14, %cst_14 {dimension_numbers = #tpu.dot_dimension_numbers<[1], [0], [0], [1], [0, 0, 1, 1], [], []>} : vector<2x16xf32>, vector<16x128xf32>, vector<2x128xf32> -> vector<2x128xf32>
    %c0_15 = arith.constant 0 : index
    %c0_16 = arith.constant 0 : index
    %17 = vector.load %arg7[%c0_15, %c0_16] : memref<2x1xf32, #tpu.memory_space<vmem>>, vector<2x1xf32>
    %18 = vector.broadcast %17 : vector<2x1xf32> to vector<2x128xf32>
    %19 = arith.addf %16, %18 : vector<2x128xf32>
    %c0_17 = arith.constant 0 : index
    %c0_18 = arith.constant 0 : index
    %20 = vector.load %arg8[%c0_17, %c0_18] : memref<2x128xf32, #tpu.memory_space<vmem>>, vector<2x128xf32>
    tpu.vector_store %arg8[%c0_17, %c0_18], %19 {strides = array<i32>} : memref<2x128xf32, #tpu.memory_space<vmem>>, vector<2x128xf32>,
    return
  }
  func.func @transform_0(%arg0: i32) -> (i32, i32) {
    %c0_i32 = arith.constant 0 : i32
    %c0_i32_0 = arith.constant 0 : i32
    return %c0_i32, %arg0 : i32, i32
  }
  func.func @transform_1(%arg0: i32) -> (i32, i32) {
    %c0_i32 = arith.constant 0 : i32
    %c0_i32_0 = arith.constant 0 : i32
    %c0_i32_1 = arith.constant 0 : i32
    return %c0_i32, %c0_i32_0 : i32, i32
  }
  func.func @transform_2(%arg0: i32) -> (i32, i32) {
    %c0_i32 = arith.constant 0 : i32
    %c0_i32_0 = arith.constant 0 : i32
    %c0_i32_1 = arith.constant 0 : i32
    return %c0_i32, %c0_i32_0 : i32, i32
  }
  func.func @transform_3(%arg0: i32) -> (i32, i32) {
    %c0_i32 = arith.constant 0 : i32
    %c0_i32_0 = arith.constant 0 : i32
    %c0_i32_1 = arith.constant 0 : i32
    return %c0_i32, %c0_i32_0 : i32, i32
  }
  func.func @transform_4(%arg0: i32) -> (i32, i32) {
    %c0_i32 = arith.constant 0 : i32
    %c0_i32_0 = arith.constant 0 : i32
    %c0_i32_1 = arith.constant 0 : i32
    return %c0_i32, %c0_i32_0 : i32, i32
  }
  func.func @transform_5(%arg0: i32) -> (i32, i32) {
    %c0_i32 = arith.constant 0 : i32
    %c0_i32_0 = arith.constant 0 : i32
    %c0_i32_1 = arith.constant 0 : i32
    return %c0_i32, %c0_i32_0 : i32, i32
  }
  func.func @transform_6(%arg0: i32) -> (i32, i32) {
    %c0_i32 = arith.constant 0 : i32
    %c0_i32_0 = arith.constant 0 : i32
    %c0_i32_1 = arith.constant 0 : i32
    return %c0_i32, %c0_i32_0 : i32, i32
  }
  func.func @transform_7(%arg0: i32) -> (i32, i32) {
    %c0_i32 = arith.constant 0 : i32
    %c0_i32_0 = arith.constant 0 : i32
    return %c0_i32, %arg0 : i32, i32
  }
}

</mosaic_0001>

<bundles_post_ra>
// kernel: tpu_custom_call.1
= control target key start
LH: loop header
LB: loop body
LE: loop exit
PB: predicated region body
PF: predicated region fallthrough
CT: control target
= control target key end

     0   :  { %vm69_vm0 = vcmask 1042432   ;;  %vm56_vm1 = vcmask 23552   ;;  %v432_v5 = vmov 0   ;;  %s530_s0 = inlined_call_operand.vmem [shape: f32[3,128], index: 0, kind: input, shape index: {}]   ;;  %s531_s1 = inlined_call_operand.vmem [shape: f32[32,3], index: 1, kind: input, shape index: {}]   ;;  %s532_s2 = inlined_call_operand.vmem [shape: f32[32,1], index: 2, kind: input, shape index: {}]   ;;  %s533_s3 = inlined_call_operand.vmem [shape: f32[16,32], index: 3, kind: input, shape index: {}]   ;;  %s534_s4 = inlined_call_operand.vmem [shape: f32[16,1], index: 4, kind: input, shape index: {}]   ;;  %s535_s5 = inlined_call_operand.vmem [shape: f32[2,16], index: 5, kind: input, shape index: {}]   ;;  %s536_s6 = inlined_call_operand.vmem [shape: f32[2,1], index: 6, kind: input, shape index: {}]   ;;  %s537_s7 = inlined_call_operand.hbm [shape: f32[2,128], index: 7, kind: output, shape index: {}]  }
   0x1   :  { %v27_v0 = vld [vmem:[%s530_s0] sm:$0x7]  ;;  %v29_v2 = vld [vmem:[%s531_s1 + $0x8] sm:$0xff]  ;;  %v30_v3 = vld [vmem:[%s531_s1 + $0x10] sm:$0xff]  ;;  %408 = vset.pattern.permute.xlu0 %v432_v5  ;;  %409 = vset.pattern.permute.xlu1 %v432_v5 }
   0x2   :  { %v28_v1 = vld [vmem:[%s531_s1] sm:$0xff]  ;;  %378 = vmatprep.subr.msk.mxu0 %vm69_vm0, %v27_v0  ;;  %v35_v4 = vld [vmem:[%s532_s2 + $0x18] sm:$0xff]  ;;  %v33_v6 = vld [vmem:[%s532_s2 + $0x8] sm:$0xff] }
   0x3   :  { %380 = vmatprep.mubr.msk.f32.mxu0 %vm56_vm1, %v28_v1  ;;  %379 = vmatpush3.msk.msra.mxu0 %vm69_vm0, %v27_v0  ;;  %v31_v7 = vld [vmem:[%s531_s1 + $0x18] sm:$0xff]  ;;  %v34_v8 = vld [vmem:[%s532_s2 + $0x10] sm:$0xff] }
   0x4   :  { %381 = vmatmul.mubr.msk.f32.vlgmr.msra.gmra.mxu0 %vm56_vm1, %v29_v2  ;;  %53 = vperm.xlu0 %408, %v35_v4  }
   0x5   :  { %383 = vmatprep.mubr.msk.f32.mxu0 %vm56_vm1, %v30_v3 }
   0x6   :  { %12 = vsyncpa [#allocation3], 0  ;;  %43 = vperm.xlu1 %409, %v33_v6   ;;  %v32_v9 = vld [vmem:[%s532_s2] sm:$0xff]  ;;  %v165_v10 = vld [vmem:[%s534_s4 + $0x8] sm:$0xff]  ;;  %vm176_vm2 = vcmask 261120   ;;  %v433_v31 = vmov 0.0  }
   0x7   :  { %v164_v11 = vld [vmem:[%s534_s4] sm:$0xff]  ;;  %v163_v30 = vld [vmem:[%s533_s3 + $0x8] sm:$0xff]  ;;  %397 = vmatprep.subr.mxu0 %v433_v31  ;;  %vm434_vm3 = vmmov 0   ;;  %vm267_vm4 = vcmask 130048  }
   0x8   :  { %384 = vmatmul.mubr.msk.f32.gmra.mxu0 %vm56_vm1, %v31_v7  ;;  %48 = vperm.xlu0 %408, %v34_v8   ;;  %v261_v12 = vld [vmem:[%s536_s6] sm:$0x3] }
   0x9   :  { %v162_v13 = vld [vmem:[%s533_s3] sm:$0xff]  ;;  %401 = vmatprep.mubr.msk.f32.mxu0 %vm434_vm3, %v433_v31  ;;  %s435_s3 = smov [#allocation2]  }
   0xa   :  { %38 = vperm.xlu1 %409, %v32_v9   ;;  %394 = vmatprep.mubr.msk.f32.mxu1 %vm176_vm2, %v162_v13  ;;  %v260_v40 = vld [vmem:[%s535_s5] sm:$0x3]  ;;  %s348_s26 = sshll.u32 %s435_s3, 4  ;;  %s349_s26 = int_to_ptr.vmem [resolvable:$true] %s348_s26 }
   0xb   :  { %s410_s27 = scalar_lea.vmem %s349_s26, 32  ;;  %p415_p1 = scmp.lt.s32.totalorder %s349_s26, %s349_s26 }
   0xc   :  { %173 = vperm.xlu0 %408, %v165_v10   ;;  %p411_p0 = scmp.ne.s32.totalorder %s349_s26, %s410_s27  ;;  %p416_p2 = scmp.lt.s32.totalorder %s410_s27, %s410_s27 }
   0xe   :  { %168 = vperm.xlu1 %409, %v164_v11   ;;  %p417_p3 = por %p416_p2, %p415_p1 }
  0x10   :  { %264 = vperm.xlu0 %408, %v261_v12   ;;  %p418_p4 = pnand %p417_p3, %p411_p0 }
  0x7f   :  { %v54_v14 = vpop.permute.xlu0 %53 }
  0x81   :  { %v44_v15 = vpop.permute.xlu1 %43 }
  0x83   :  { %v49_v19 = vpop.permute.xlu0 %48 }
  0x85   :  { %v39_v21 = vpop.permute.xlu1 %38 }
  0x87   :  { %v174_v32 = vpop.permute.xlu0 %173 }
  0x89   :  { %v169_v35 = vpop.permute.xlu1 %168 }
  0x8b   :  { %v265_v41 = vpop.permute.xlu0 %264 }
  0xc4   :  { %v382_v16 = vpop.f32.mrf.mxu0 }
  0xc5   :  { %v145_v23 = vadd.f32 %v382_v16, %v44_v15 }
  0xc6   :  { %v139_v17 = vpop.f32.mrf.mxu0 }
  0xc7   :  { %v140_v26 = vadd.f32 %v139_v17, %v39_v21  ;;  %v159_v28 = vmax.f32 %v145_v23, 0.0 }
  0xc8   :  { %v385_v18 = vpop.f32.mrf.mxu0 }
  0xc9   :  { %v155_v20 = vadd.f32 %v385_v18, %v54_v14  ;;  %v158_v29 = vmax.f32 %v140_v26, 0.0 }
  0xca   :  { %v149_v22 = vpop.f32.mrf.mxu0 }
  0xcb   :  { %v161_v24 = vmax.f32 %v155_v20, 0.0  ;;  %v150_v25 = vadd.f32 %v149_v22, %v49_v19 }
  0xcd   :  { %v160_v27 = vmax.f32 %v150_v25, 0.0  ;;  %386 = vmatprep.subr.mxu1 %v161_v24 }
  0xce   :  { %387 = vmatpush3.msra.mxu1 %v161_v24 }
  0xcf   :  { %388 = vmatprep.subr.mxu1 %v160_v27 }
  0xd0   :  { %389 = vmatpush3.msra.mxu1 %v160_v27 }
  0xd1   :  { %390 = vmatprep.subr.mxu1 %v159_v28 }
  0xd2   :  { %391 = vmatpush3.msra.mxu1 %v159_v28 }
  0xd3   :  { %392 = vmatprep.subr.mxu1 %v158_v29 }
  0xd4   :  { %393 = vmatpush3.msra.mxu1 %v158_v29 }
  0xd5   :  { %395 = vmatmul.mubr.msk.f32.vlgmr.msra.gmra.mxu1 %vm176_vm2, %v163_v30 }
 0x195   :  { %v396_v33 = vpop.f32.mrf.mxu1 }
 0x196   :  { %v255_v34 = vadd.f32 %v396_v33, %v174_v32 }
 0x197   :  { %v249_v36 = vpop.f32.mrf.mxu1 }
 0x198   :  { %v259_v37 = vmax.f32 %v255_v34, 0.0  ;;  %v250_v38 = vadd.f32 %v249_v36, %v169_v35 }
 0x19a   :  { %v258_v39 = vmax.f32 %v250_v38, 0.0  ;;  %398 = vmatpush3.msra.mxu0 %v259_v37 }
 0x19b   :  { %399 = vmatprep.subr.mxu0 %v433_v31 }
 0x19c   :  { %400 = vmatpush3.msra.mxu0 %v258_v39 }
 0x19d   :  { %402 = vmatmul.mubr.msk.f32.vlgmr.msra.gmra.mxu0 %vm267_vm4, %v260_v40 }
 0x25d   :  { %v337_v42 = vpop.f32.mrf.mxu0 }
 0x25e   :  { %v338_v43 = vadd.f32 %v337_v42, %v265_v41 }
 0x25f   :  { %v403_v44 = vpop.f32.mrf.mxu0 }
 0x260   :  { %341 = vst [vmem:[#allocation2] sm:$0x3] %v338_v43 }
 0x261   :  { %421 = shalt.err (!%p418_p4)
}
 0x262   :  { %351 = dma.vmem_to_hbm [thread:$0]  %s349_s26, 32, %s537_s7, [#allocation3]  }
 0x263   :  { %430 = dma.done.wait [#allocation3], 32  }
 0x264   :  { %431 = vsyncadd [#allocation3], 4294967264 }
 0x265   :  { %355 = vsyncpa [#allocation3], 1 }

</bundles_post_ra>
